<compile_context>
chip_gen: v6e
topology: v6e:2x2x1
jax: 0.10.0
libtpu: 0.0.40
codegen_flags: <defaults>
</compile_context>

<pallas_src>
import jax
import jax.numpy as jnp
from jax.experimental import pallas as pl
from jax.experimental.pallas import tpu as pltpu


def _round_up(v, mult):
    return ((v + mult - 1) // mult) * mult


def _round_down(v, mult):
    return (v // mult) * mult


def _cdiv(a, b):
    return (a + b - 1) // b


def _vmem_capacity_bytes():
    try:
        cap = int(pltpu.get_tpu_info().vmem_capacity_bytes)
        if cap > 0:
            return cap
    except Exception:
        pass
    return 64 * 1024 * 1024  # conservative fallback == v7x per-TC VMEM


def _low_rank_rotate_kernel(x_ref, w_ref, o_ref):
    # (TM, n) @ (n, m) -> (TM, m); f32 accumulation on the MXU.
    x = x_ref[...]
    if x.dtype != w_ref.dtype:          # static at trace time; cast rides the idle VPU slot
        x = x.astype(w_ref.dtype)
    o_ref[...] = jnp.dot(
        x, w_ref[...], preferred_element_type=jnp.float32
    ).astype(o_ref.dtype)


def low_rank_rotate(x, weight):
    """Forward of LowRankRotateLayer: matmul(x.astype(weight.dtype), weight)."""
    n, m = weight.shape
    assert x.shape[-1] == n, f"last dim of x ({x.shape[-1]}) must equal n ({n})"

    lead_shape = x.shape[:-1]
    rows = 1
    for d in lead_shape:
        rows *= d
    out_dtype = weight.dtype
    if rows == 0:
        return jnp.zeros((*lead_shape, m), dtype=out_dtype)

    x2d = x.reshape(rows, n)  # no dtype change here; HBM-bound kernel streams native x

    x_isz = jnp.dtype(x.dtype).itemsize
    w_isz = jnp.dtype(weight.dtype).itemsize

    # --- cast direction -------------------------------------------------------------------
    if x.dtype == weight.dtype:
        w_op, cast_x = weight, False
    elif (jnp.issubdtype(x.dtype, jnp.floating)
          and jnp.issubdtype(weight.dtype, jnp.floating)
          and x_isz < w_isz):
        # x is the narrower float: downcast the tiny (n, m) weight instead of upcasting every
        # (TM, n) x tile; preferred_element_type=f32 keeps accumulation in f32.
        w_op, cast_x = weight.astype(x.dtype), False
    else:
        # torch semantics: x.to(weight.dtype), cast done per-tile inside the kernel.
        w_op, cast_x = weight, True

    wk_isz = jnp.dtype(w_op.dtype).itemsize
    o_isz = jnp.dtype(out_dtype).itemsize
    cc_isz = wk_isz  # element size of the in-kernel cast temporary (compute dtype)

    # Sublane multiple follows x packing: 8 (32-bit), 16 (16-bit), 32 (8-bit).
    sub = max(8, 32 // x_isz)

    # --- tile sizing from per-chip VMEM ------------------------------------------------------
    vmem_cap = _vmem_capacity_bytes()
    budget = vmem_cap * 3 // 4          # never request all of physical VMEM (headroom for Mosaic)

    if rows <= sub:
        tm = rows                       # single full-extent block (block dim == array dim)
    else:
        # per-row VMEM cost: double-buffered x tile + double-buffered out tile + cast temp
        per_row = 2 * n * x_isz + 2 * m * o_isz + (n * cc_isz if cast_x else 0)
        avail = max(budget - 2 * n * m * wk_isz, per_row * sub)
        tm_vmem = max(sub, _round_down(avail // per_row, sub))
        # keep >= 2 grid steps so ("parallel",) spreads row tiles over both v7x TensorCores
        tm_half = _round_up(_cdiv(rows, 2), sub)
        tm = max(sub, min(tm_vmem, tm_half))

    grid = (_cdiv(rows, tm),)           # ragged last tile handled by Pallas (masked writes)

    vmem_needed = (2 * tm * n * x_isz
                   + (tm * n * cc_isz if cast_x else 0)
                   + 2 * tm * m * o_isz
                   + 2 * n * m * wk_isz)
    vmem_limit = int(min(budget, max(32 * 1024 * 1024, vmem_needed + (2 << 20))))

    cost = pl.CostEstimate(
        flops=2 * rows * n * m,
        transcendentals=0,
        bytes_accessed=rows * n * x_isz + n * m * wk_isz + rows * m * o_isz,
    )

    out2d = pl.pallas_call(
        _low_rank_rotate_kernel,
        out_shape=jax.ShapeDtypeStruct((rows, m), out_dtype),
        grid_spec=pltpu.PrefetchScalarGridSpec(
            num_scalar_prefetch=0,
            grid=grid,
            in_specs=[
                pl.BlockSpec((tm, n), lambda i: (i, 0)),   # streamed x row tiles
                pl.BlockSpec((n, m), lambda i: (0, 0)),    # weight stays VMEM-resident
            ],
            out_specs=pl.BlockSpec((tm, m), lambda i: (i, 0)),
        ),
        compiler_params=pltpu.CompilerParams(
            dimension_semantics=("parallel",),  # independent row tiles -> megacore on v7x
            vmem_limit_bytes=vmem_limit,
        ),
        cost_estimate=cost,
    )(x2d, w_op)

    # TODO(synk): for the full ReFT intervention, fuse the back-projection / elementwise op here
    # so y does not make an extra HBM round trip (narrow-m output stores are already hidden).
    return out2d.reshape(*lead_shape, m)


def init_orthogonal_weight(key, n, m, dtype=jnp.float32):
    """Deterministic orthogonal init matching torch.nn.init.orthogonal_ semantics
    (semi-orthogonal matrix of shape (n, m))."""
    a = jax.random.normal(key, (max(n, m), min(n, m)), dtype=jnp.float32)
    q, r = jnp.linalg.qr(a)
    d = jnp.sign(jnp.diagonal(r))
    q = q * d[None, :]
    if n < m:
        q = q.T
    return q[:n, :m].astype(dtype)


if __name__ == "__main__":
    key = jax.random.PRNGKey(0)
    k_w, k_x = jax.random.split(key)

    batch, seq, n, m = 2, 8, 32, 4  # low-rank projection: hidden n=32 -> rank m=4
    weight = init_orthogonal_weight(k_w, n, m, dtype=jnp.float32)
    x = jax.random.normal(k_x, (batch, seq, n), dtype=jnp.float32)

    # Same-dtype path (f32 x, f32 W); rows=16 is NOT padded, ragged tiling handled by Pallas.
    out = jax.block_until_ready(low_rank_rotate(x, weight))
    ref = jnp.matmul(x.astype(weight.dtype), weight)
    assert out.shape == (batch, seq, m)
    assert jnp.allclose(out, ref, atol=1e-5, rtol=1e-5)

    # Mixed-dtype path (bf16 x, f32 W): weight is downcast, accumulation stays f32.
    x_bf16 = x.astype(jnp.bfloat16)
    out2 = jax.block_until_ready(low_rank_rotate(x_bf16, weight))
    ref2 = jnp.matmul(x_bf16.astype(weight.dtype), weight)
    assert out2.shape == (batch, seq, m) and out2.dtype == weight.dtype
    assert jnp.allclose(out2, ref2, atol=1e-1, rtol=1e-1)

    print("KERNEL_OK")
</pallas_src>

<mosaic_0001>
module attributes {stable_mosaic.version = 11 : i64} {
  func.func @_low_rank_rotate_kernel(%arg0: i32, %arg1: memref<8x32xf32, #tpu.memory_space<vmem>>, %arg2: memref<32x4xf32, #tpu.memory_space<vmem>>, %arg3: memref<8x4xf32, #tpu.memory_space<vmem>>) attributes {dimension_semantics = [#tpu.dimension_semantics<parallel>], iteration_bounds = array<i64: 2>, scalar_prefetch = 0 : i64, scratch_operands = 0 : i64, tpu.core_type = #tpu.core_type<tc>, window_params = [{transform_indices = @transform_0, window_bounds = array<i64: 8, 32>}, {pipeline_mode = #tpu.pipeline_mode<synchronous>, transform_indices = @transform_1, window_bounds = array<i64: 32, 4>}, {transform_indices = @transform_2, window_bounds = array<i64: 8, 4>}]} {
    %c0 = arith.constant 0 : index
    %c0_0 = arith.constant 0 : index
    %0 = vector.load %arg1[%c0, %c0_0] : memref<8x32xf32, #tpu.memory_space<vmem>>, vector<8x32xf32>
    %c0_1 = arith.constant 0 : index
    %c0_2 = arith.constant 0 : index
    %1 = vector.load %arg2[%c0_1, %c0_2] : memref<32x4xf32, #tpu.memory_space<vmem>>, vector<32x4xf32>
    %cst = arith.constant dense<0.000000e+00> : vector<8x4xf32>
    %2 = tpu.matmul %0, %1, %cst {dimension_numbers = #tpu.dot_dimension_numbers<[1], [0], [0], [1], [0, 0, 1, 1], [], []>} : vector<8x32xf32>, vector<32x4xf32>, vector<8x4xf32> -> vector<8x4xf32>
    %c0_3 = arith.constant 0 : index
    %c0_4 = arith.constant 0 : index
    %3 = vector.load %arg3[%c0_3, %c0_4] : memref<8x4xf32, #tpu.memory_space<vmem>>, vector<8x4xf32>
    tpu.vector_store %arg3[%c0_3, %c0_4], %2 {strides = array<i32>} : memref<8x4xf32, #tpu.memory_space<vmem>>, vector<8x4xf32>,
    return
  }
  func.func @transform_0(%arg0: i32) -> (i32, i32) {
    %c0_i32 = arith.constant 0 : i32
    %c0_i32_0 = arith.constant 0 : i32
    return %arg0, %c0_i32 : i32, i32
  }
  func.func @transform_1(%arg0: i32) -> (i32, i32) {
    %c0_i32 = arith.constant 0 : i32
    %c0_i32_0 = arith.constant 0 : i32
    %c0_i32_1 = arith.constant 0 : i32
    return %c0_i32, %c0_i32_0 : i32, i32
  }
  func.func @transform_2(%arg0: i32) -> (i32, i32) {
    %c0_i32 = arith.constant 0 : i32
    %c0_i32_0 = arith.constant 0 : i32
    return %arg0, %c0_i32 : i32, i32
  }
}

</mosaic_0001>

<bundles_post_ra>
// kernel: tpu_custom_call.1
= control target key start
LH: loop header
LB: loop body
LE: loop exit
PB: predicated region body
PF: predicated region fallthrough
CT: control target
= control target key end

     0   :  { %s334_s9 = smov 0   ;;  %s363_s0 = inlined_call_operand.vmem [shape: f32[16,32], index: 0, kind: input, shape index: {}]   ;;  %s364_s1 = inlined_call_operand.vmem [shape: f32[32,4], index: 1, kind: input, shape index: {}]   ;;  %s365_s2 = inlined_call_operand.vmem [shape: f32[16,4], index: 2, kind: output, shape index: {}]  }
   0x1 LB: > { %s273_s10 = sadd.s32 4294967295, %s315_s9   ;;  %p277_p0 = scmp.ge.s32.totalorder %s315_s9, 1  ;;  %s315_s9 = sphi %s334_s9, %s12_s9  }
   0x2   : > { %p111_p1 = scmp.lt.s32.totalorder %s315_s9, 3 }
   0x4   : > { %p112_p2 = pnand %p277_p0, %p111_p1 }
   0x5   : > { %p131_p3 = scmp.lt.s32.totalorder (!%p112_p2), %s273_s10, 1 }
   0x6   : > { %115 = sbr.rel (%p112_p2) target bundleno = 215 (0xd7), region = 28 }
   0xb   : > { %v143_v0 = vld [vmem:[%s364_s1 + $0x18] sm:$0xff]  ;;  %v317_v1 = vmov 0.0   ;;  %v142_v2 = vld [vmem:[%s364_s1 + $0x10] sm:$0xff]  ;;  %vm318_vm0 = vmmov 0   ;;  %s367_s10 = smov (!%p131_p3, %s273_s10), 1  ;;  %v141_v3 = vld [vmem:[%s364_s1 + $0x8] sm:$0xff] }
   0xc   : > { %288 = vmatprep.subr.mxu0 %v317_v1  ;;  %296 = vmatprep.mubr.msk.f32.mxu0 %vm318_vm0, %v317_v1  ;;  %s278_s17 = sshll.u32 %s367_s10, 3  ;;  %v140_v4 = vld [vmem:[%s364_s1] sm:$0xff]  ;;  %vm144_vm1 = vcmask 261120   ;;  %vm218_vm2 = vcmask 31744  }
   0xd   : > { %289 = vmatpush3.msra.mxu0 %v143_v0  ;;  %s134_s22 = scalar_lea.vmem %s363_s0, %s278_s17  ;;  %s138_s25 = scalar_lea.vmem %s365_s2, %s278_s17 }
   0xe   : > { %290 = vmatprep.subr.mxu0 %v317_v1  ;;  %v139_v5 = vld [vmem:[%s134_s22] sm:$0xff] }
   0xf   : > { %291 = vmatpush3.msra.mxu0 %v142_v2 }
  0x10   : > { %292 = vmatprep.subr.mxu0 %v317_v1 }
  0x11   : > { %293 = vmatpush3.msra.mxu0 %v141_v3 }
  0x12   : > { %294 = vmatprep.subr.mxu0 %v317_v1 }
  0x13   : > { %295 = vmatpush3.msra.mxu0 %v140_v4 }
  0x14   : > { %297 = vmatmul.mubr.msk.f32.vlgmr.msra.gmra.mxu0 %vm144_vm1, %v139_v5 }
  0xd4   : > { %v214_v6 = vpop.f32.mrf.mxu0 }
  0xd5   : > { %219 = vst.msk [vmem:[%s138_s25] sm:$0xff] %vm218_vm2, %v214_v6 }
  0xd6   : > { %v298_v7 = vpop.f32.mrf.mxu0 }
  0xd7 PF: > { %s12_s9 = sadd.s32 1, %s315_s9  }
  0xd8   : > { %p9_p4 = scmp.ge.s32.totalorder %s12_s9, 4  }
  0xda   :  { %11 = sbr.rel (!%p9_p4) target bundleno = 1 (0x1), region = 58 }

</bundles_post_ra>
